<compile_context>
chip_gen: v7x
topology: tpu7x:2x2x1
jax: 0.10.0
libtpu: 0.0.40
codegen_flags: <defaults>
</compile_context>

<pallas_src>
import functools

import jax
import jax.numpy as jnp
from jax.experimental import pallas as pl
from jax.experimental.pallas import tpu as pltpu


def _gru_fc_kernel(x_ref, wih_ref, whh_ref, bg_ref, bhn_ref, fcw_ref, fcb_ref,
                   y_ref, *, seq_len, batch, hidden):
    """Whole GRU recurrence + final fc in one kernel invocation (grid=()).

    Refs (all whole-array VMEM blocks):
      x_ref   : (S*B, E)   time-major embedded sequence (row t*B+b = step t, batch b)
      wih_ref : (3, E, H)  input->gate weights, gate-major (r, z, n), transposed
      whh_ref : (3, H, H)  hidden->gate weights, gate-major, transposed
      bg_ref  : (3, 1, H)  folded gate biases: [b_ir+b_hr, b_iz+b_hz, b_in]
      bhn_ref : (1, H)     b_hn (must stay inside r*(h@W_hn + b_hn))
      fcw_ref : (H, O)     final linear weights (transposed)
      fcb_ref : (1, O)
      y_ref   : (B, O)     output = fc(h_final)
    """
    B = batch

    x = x_ref[...]                                                    # (S*B, E)

    # Hoisted input->gate projections: one matmul per gate over ALL time steps.
    gi_r = jnp.dot(x, wih_ref[0], preferred_element_type=jnp.float32) + bg_ref[0]
    gi_z = jnp.dot(x, wih_ref[1], preferred_element_type=jnp.float32) + bg_ref[1]
    gi_n = jnp.dot(x, wih_ref[2], preferred_element_type=jnp.float32) + bg_ref[2]

    w_hr = whh_ref[0]                                                 # (H, H)
    w_hz = whh_ref[1]
    w_hn = whh_ref[2]
    b_hn = bhn_ref[...]                                               # (1, H)

    h = jnp.zeros((B, hidden), jnp.float32)                           # h0 = zeros

    # Fully-unrolled time recurrence (S is a static Python int); only the
    # hidden->gate matmuls remain on the serial critical path.
    for t in range(seq_len):
        lo = t * B                                                    # sublane-aligned (B=8)
        ir = gi_r[lo:lo + B, :]
        iz = gi_z[lo:lo + B, :]
        i_n = gi_n[lo:lo + B, :]

        r = jax.nn.sigmoid(
            ir + jnp.dot(h, w_hr, preferred_element_type=jnp.float32))
        z = jax.nn.sigmoid(
            iz + jnp.dot(h, w_hz, preferred_element_type=jnp.float32))
        n = jnp.tanh(
            i_n + r * (jnp.dot(h, w_hn, preferred_element_type=jnp.float32) + b_hn))
        h = n + z * (h - n)                                           # == (1-z)*n + z*h

    y_ref[...] = (jnp.dot(h, fcw_ref[...], preferred_element_type=jnp.float32)
                  + fcb_ref[...])


def gru_layer_forward(token_ids, word_embeddings, gru_params, fc_params):
    """Glue (embedding gather + weight layout prep) + the Pallas GRU+fc kernel.

    gru_params: PyTorch-layout (w_ih (3H,E), w_hh (3H,H), b_ih (3H,), b_hh (3H,))
    fc_params : (fc_w (O,H), fc_b (O,))
    """
    w_ih, w_hh, b_ih, b_hh = gru_params
    fc_w, fc_b = fc_params

    B, S = token_ids.shape
    assert S >= 1, "empty sequence"
    E = word_embeddings.shape[1]
    H = w_hh.shape[1]
    O = fc_w.shape[0]

    # ---- layout prep (runs once in XLA) ----
    # Gate-major + transposed so the kernel computes x @ W per gate.
    w_ih_g = jnp.transpose(w_ih.reshape(3, H, E), (0, 2, 1))          # (3, E, H)
    w_hh_g = jnp.transpose(w_hh.reshape(3, H, H), (0, 2, 1))          # (3, H, H)
    b_ih_g = b_ih.reshape(3, 1, H)
    b_hh_g = b_hh.reshape(3, 1, H)
    # Fold r/z biases; n-gate hidden bias must stay separate (inside r*(...)).
    b_gates = jnp.stack([b_ih_g[0] + b_hh_g[0],
                         b_ih_g[1] + b_hh_g[1],
                         b_ih_g[2]], axis=0)                          # (3, 1, H)
    b_hn = b_hh_g[2]                                                  # (1, H)
    fc_w_t = fc_w.T                                                   # (H, O)
    fc_b2 = fc_b.reshape(1, O)

    # Time-major embedding gather: rows come out already in (t, b) order,
    # no materialized transpose of the embedded sequence.
    ids_tm = token_ids.T.reshape(-1)                                  # (S*B,)
    x_flat = jnp.take(word_embeddings, ids_tm, axis=0).astype(jnp.float32)  # (S*B, E)

    kernel = functools.partial(_gru_fc_kernel, seq_len=S, batch=B, hidden=H)

    y = pl.pallas_call(
        kernel,
        out_shape=jax.ShapeDtypeStruct((B, O), jnp.float32),
        in_specs=[pl.BlockSpec(memory_space=pltpu.MemorySpace.VMEM)] * 7,
        out_specs=pl.BlockSpec(memory_space=pltpu.MemorySpace.VMEM),
    )(x_flat, w_ih_g, w_hh_g, b_gates, b_hn, fc_w_t, fc_b2)
    return y


def _reference_forward(token_ids, word_embeddings, gru_params, fc_params):
    """Pure-JAX reference of the same forward pass, from raw PyTorch-layout params."""
    w_ih, w_hh, b_ih, b_hh = gru_params
    fc_w, fc_b = fc_params
    H = w_hh.shape[1]

    x_emb = jnp.take(word_embeddings, token_ids, axis=0).astype(jnp.float32)  # (B, S, E)
    B = x_emb.shape[0]

    def step(h, x_t):
        gi = x_t @ w_ih.T + b_ih
        gh = h @ w_hh.T + b_hh
        r = jax.nn.sigmoid(gi[:, :H] + gh[:, :H])
        z = jax.nn.sigmoid(gi[:, H:2 * H] + gh[:, H:2 * H])
        n = jnp.tanh(gi[:, 2 * H:] + r * gh[:, 2 * H:])
        h_new = (1.0 - z) * n + z * h
        return h_new, None

    h0 = jnp.zeros((B, H), jnp.float32)
    h_final, _ = jax.lax.scan(step, h0, jnp.transpose(x_emb, (1, 0, 2)))
    return h_final @ fc_w.T + fc_b


if __name__ == "__main__":
    # Small shapes consistent with the module's forward.
    VOCAB, EMBED = 20, 32          # word_embeddings: (vocab, input_size)
    BATCH, SEQ = 8, 8
    HIDDEN, OUTPUT = 32, 4

    key = jax.random.PRNGKey(0)
    k_emb, k_ih, k_hh, k_bih, k_bhh, k_fcw, k_fcb, k_tok = jax.random.split(key, 8)

    word_embeddings = jax.random.normal(k_emb, (VOCAB, EMBED), jnp.float32)

    # PyTorch GRU param shapes: weight_ih (3H, E), weight_hh (3H, H), biases (3H,).
    scale = 1.0 / jnp.sqrt(HIDDEN)
    w_ih = jax.random.uniform(k_ih, (3 * HIDDEN, EMBED), jnp.float32, -scale, scale)
    w_hh = jax.random.uniform(k_hh, (3 * HIDDEN, HIDDEN), jnp.float32, -scale, scale)
    b_ih = jax.random.uniform(k_bih, (3 * HIDDEN,), jnp.float32, -scale, scale)
    b_hh = jax.random.uniform(k_bhh, (3 * HIDDEN,), jnp.float32, -scale, scale)
    fc_w = jax.random.uniform(k_fcw, (OUTPUT, HIDDEN), jnp.float32, -0.3, 0.3)  # xavier-ish
    fc_b = jnp.zeros((OUTPUT,), jnp.float32)

    gru_params = (w_ih, w_hh, b_ih, b_hh)
    fc_params = (fc_w, fc_b)

    token_ids = jax.random.randint(k_tok, (BATCH, SEQ), 0, VOCAB, jnp.int32)

    y = gru_layer_forward(token_ids, word_embeddings, gru_params, fc_params)
    y = jax.block_until_ready(y)

    y_ref = _reference_forward(token_ids, word_embeddings, gru_params, fc_params)
    assert y.shape == (BATCH, OUTPUT)
    assert jnp.allclose(y, y_ref, atol=1e-4, rtol=1e-4), (
        f"max abs err = {jnp.max(jnp.abs(y - y_ref))}")

    print("KERNEL_OK")
</pallas_src>

<mosaic_0001>
module attributes {stable_mosaic.version = 11 : i64} {
  func.func @_gru_fc_kernel(%arg0: memref<64x32xf32, #tpu.memory_space<vmem>>, %arg1: memref<3x32x32xf32, #tpu.memory_space<vmem>>, %arg2: memref<3x32x32xf32, #tpu.memory_space<vmem>>, %arg3: memref<3x1x32xf32, #tpu.memory_space<vmem>>, %arg4: memref<1x32xf32, #tpu.memory_space<vmem>>, %arg5: memref<32x4xf32, #tpu.memory_space<vmem>>, %arg6: memref<1x4xf32, #tpu.memory_space<vmem>>, %arg7: memref<8x4xf32, #tpu.memory_space<vmem>>) attributes {dimension_semantics = [], scalar_prefetch = 0 : i64, scratch_operands = 0 : i64, tpu.core_type = #tpu.core_type<tc>} {
    %c0 = arith.constant 0 : index
    %c0_0 = arith.constant 0 : index
    %0 = vector.load %arg0[%c0, %c0_0] : memref<64x32xf32, #tpu.memory_space<vmem>>, vector<64x32xf32>
    %c0_1 = arith.constant 0 : index
    %c0_2 = arith.constant 0 : index
    %c0_3 = arith.constant 0 : index
    %1 = vector.load %arg1[%c0_1, %c0_2, %c0_3] : memref<3x32x32xf32, #tpu.memory_space<vmem>>, vector<1x32x32xf32>
    %2 = vector.shape_cast %1 : vector<1x32x32xf32> to vector<32x32xf32>
    %cst = arith.constant dense<0.000000e+00> : vector<64x32xf32>
    %3 = tpu.matmul %0, %2, %cst {dimension_numbers = #tpu.dot_dimension_numbers<[1], [0], [0], [1], [0, 0, 1, 1], [], []>} : vector<64x32xf32>, vector<32x32xf32>, vector<64x32xf32> -> vector<64x32xf32>
    %c0_4 = arith.constant 0 : index
    %c0_5 = arith.constant 0 : index
    %c0_6 = arith.constant 0 : index
    %4 = vector.load %arg3[%c0_4, %c0_5, %c0_6] : memref<3x1x32xf32, #tpu.memory_space<vmem>>, vector<1x1x32xf32>
    %5 = vector.shape_cast %4 : vector<1x1x32xf32> to vector<1x32xf32>
    %6 = vector.broadcast %5 : vector<1x32xf32> to vector<64x32xf32>
    %7 = arith.addf %3, %6 : vector<64x32xf32>
    %c1 = arith.constant 1 : index
    %c0_7 = arith.constant 0 : index
    %c0_8 = arith.constant 0 : index
    %8 = vector.load %arg1[%c1, %c0_7, %c0_8] : memref<3x32x32xf32, #tpu.memory_space<vmem>>, vector<1x32x32xf32>
    %9 = vector.shape_cast %8 : vector<1x32x32xf32> to vector<32x32xf32>
    %cst_9 = arith.constant dense<0.000000e+00> : vector<64x32xf32>
    %10 = tpu.matmul %0, %9, %cst_9 {dimension_numbers = #tpu.dot_dimension_numbers<[1], [0], [0], [1], [0, 0, 1, 1], [], []>} : vector<64x32xf32>, vector<32x32xf32>, vector<64x32xf32> -> vector<64x32xf32>
    %c1_10 = arith.constant 1 : index
    %c0_11 = arith.constant 0 : index
    %c0_12 = arith.constant 0 : index
    %11 = vector.load %arg3[%c1_10, %c0_11, %c0_12] : memref<3x1x32xf32, #tpu.memory_space<vmem>>, vector<1x1x32xf32>
    %12 = vector.shape_cast %11 : vector<1x1x32xf32> to vector<1x32xf32>
    %13 = vector.broadcast %12 : vector<1x32xf32> to vector<64x32xf32>
    %14 = arith.addf %10, %13 : vector<64x32xf32>
    %c2 = arith.constant 2 : index
    %c0_13 = arith.constant 0 : index
    %c0_14 = arith.constant 0 : index
    %15 = vector.load %arg1[%c2, %c0_13, %c0_14] : memref<3x32x32xf32, #tpu.memory_space<vmem>>, vector<1x32x32xf32>
    %16 = vector.shape_cast %15 : vector<1x32x32xf32> to vector<32x32xf32>
    %cst_15 = arith.constant dense<0.000000e+00> : vector<64x32xf32>
    %17 = tpu.matmul %0, %16, %cst_15 {dimension_numbers = #tpu.dot_dimension_numbers<[1], [0], [0], [1], [0, 0, 1, 1], [], []>} : vector<64x32xf32>, vector<32x32xf32>, vector<64x32xf32> -> vector<64x32xf32>
    %c2_16 = arith.constant 2 : index
    %c0_17 = arith.constant 0 : index
    %c0_18 = arith.constant 0 : index
    %18 = vector.load %arg3[%c2_16, %c0_17, %c0_18] : memref<3x1x32xf32, #tpu.memory_space<vmem>>, vector<1x1x32xf32>
    %19 = vector.shape_cast %18 : vector<1x1x32xf32> to vector<1x32xf32>
    %20 = vector.broadcast %19 : vector<1x32xf32> to vector<64x32xf32>
    %21 = arith.addf %17, %20 : vector<64x32xf32>
    %c0_19 = arith.constant 0 : index
    %c0_20 = arith.constant 0 : index
    %c0_21 = arith.constant 0 : index
    %22 = vector.load %arg2[%c0_19, %c0_20, %c0_21] : memref<3x32x32xf32, #tpu.memory_space<vmem>>, vector<1x32x32xf32>
    %23 = vector.shape_cast %22 : vector<1x32x32xf32> to vector<32x32xf32>
    %c1_22 = arith.constant 1 : index
    %c0_23 = arith.constant 0 : index
    %c0_24 = arith.constant 0 : index
    %24 = vector.load %arg2[%c1_22, %c0_23, %c0_24] : memref<3x32x32xf32, #tpu.memory_space<vmem>>, vector<1x32x32xf32>
    %25 = vector.shape_cast %24 : vector<1x32x32xf32> to vector<32x32xf32>
    %c2_25 = arith.constant 2 : index
    %c0_26 = arith.constant 0 : index
    %c0_27 = arith.constant 0 : index
    %26 = vector.load %arg2[%c2_25, %c0_26, %c0_27] : memref<3x32x32xf32, #tpu.memory_space<vmem>>, vector<1x32x32xf32>
    %27 = vector.shape_cast %26 : vector<1x32x32xf32> to vector<32x32xf32>
    %c0_28 = arith.constant 0 : index
    %c0_29 = arith.constant 0 : index
    %28 = vector.load %arg4[%c0_28, %c0_29] : memref<1x32xf32, #tpu.memory_space<vmem>>, vector<1x32xf32>
    %cst_30 = arith.constant 0.000000e+00 : f32
    %29 = vector.broadcast %cst_30 : f32 to vector<8x32xf32>
    %30 = vector.extract_strided_slice %7 {offsets = [0, 0], sizes = [8, 32], strides = [1, 1]} : vector<64x32xf32> to vector<8x32xf32>
    %31 = vector.extract_strided_slice %14 {offsets = [0, 0], sizes = [8, 32], strides = [1, 1]} : vector<64x32xf32> to vector<8x32xf32>
    %32 = vector.extract_strided_slice %21 {offsets = [0, 0], sizes = [8, 32], strides = [1, 1]} : vector<64x32xf32> to vector<8x32xf32>
    %cst_31 = arith.constant dense<0.000000e+00> : vector<8x32xf32>
    %33 = tpu.matmul %29, %23, %cst_31 {dimension_numbers = #tpu.dot_dimension_numbers<[1], [0], [0], [1], [0, 0, 1, 1], [], []>} : vector<8x32xf32>, vector<32x32xf32>, vector<8x32xf32> -> vector<8x32xf32>
    %34 = arith.addf %30, %33 : vector<8x32xf32>
    %35 = arith.negf %34 : vector<8x32xf32>
    %36 = math.exp %35 : vector<8x32xf32>
    %cst_32 = arith.constant 1.000000e+00 : f32
    %37 = vector.broadcast %cst_32 : f32 to vector<8x32xf32>
    %38 = arith.addf %37, %36 : vector<8x32xf32>
    %39 = arith.divf %37, %38 : vector<8x32xf32>
    %cst_33 = arith.constant dense<0.000000e+00> : vector<8x32xf32>
    %40 = tpu.matmul %29, %25, %cst_33 {dimension_numbers = #tpu.dot_dimension_numbers<[1], [0], [0], [1], [0, 0, 1, 1], [], []>} : vector<8x32xf32>, vector<32x32xf32>, vector<8x32xf32> -> vector<8x32xf32>
    %41 = arith.addf %31, %40 : vector<8x32xf32>
    %42 = arith.negf %41 : vector<8x32xf32>
    %43 = math.exp %42 : vector<8x32xf32>
    %cst_34 = arith.constant 1.000000e+00 : f32
    %44 = vector.broadcast %cst_34 : f32 to vector<8x32xf32>
    %45 = arith.addf %44, %43 : vector<8x32xf32>
    %46 = arith.divf %44, %45 : vector<8x32xf32>
    %cst_35 = arith.constant dense<0.000000e+00> : vector<8x32xf32>
    %47 = tpu.matmul %29, %27, %cst_35 {dimension_numbers = #tpu.dot_dimension_numbers<[1], [0], [0], [1], [0, 0, 1, 1], [], []>} : vector<8x32xf32>, vector<32x32xf32>, vector<8x32xf32> -> vector<8x32xf32>
    %48 = vector.broadcast %28 : vector<1x32xf32> to vector<8x32xf32>
    %49 = arith.addf %47, %48 : vector<8x32xf32>
    %50 = arith.mulf %39, %49 : vector<8x32xf32>
    %51 = arith.addf %32, %50 : vector<8x32xf32>
    %52 = math.tanh %51 : vector<8x32xf32>
    %53 = arith.subf %29, %52 : vector<8x32xf32>
    %54 = arith.mulf %46, %53 : vector<8x32xf32>
    %55 = arith.addf %52, %54 : vector<8x32xf32>
    %56 = vector.extract_strided_slice %7 {offsets = [8, 0], sizes = [8, 32], strides = [1, 1]} : vector<64x32xf32> to vector<8x32xf32>
    %57 = vector.extract_strided_slice %14 {offsets = [8, 0], sizes = [8, 32], strides = [1, 1]} : vector<64x32xf32> to vector<8x32xf32>
    %58 = vector.extract_strided_slice %21 {offsets = [8, 0], sizes = [8, 32], strides = [1, 1]} : vector<64x32xf32> to vector<8x32xf32>
    %cst_36 = arith.constant dense<0.000000e+00> : vector<8x32xf32>
    %59 = tpu.matmul %55, %23, %cst_36 {dimension_numbers = #tpu.dot_dimension_numbers<[1], [0], [0], [1], [0, 0, 1, 1], [], []>} : vector<8x32xf32>, vector<32x32xf32>, vector<8x32xf32> -> vector<8x32xf32>
    %60 = arith.addf %56, %59 : vector<8x32xf32>
    %61 = arith.negf %60 : vector<8x32xf32>
    %62 = math.exp %61 : vector<8x32xf32>
    %cst_37 = arith.constant 1.000000e+00 : f32
    %63 = vector.broadcast %cst_37 : f32 to vector<8x32xf32>
    %64 = arith.addf %63, %62 : vector<8x32xf32>
    %65 = arith.divf %63, %64 : vector<8x32xf32>
    %cst_38 = arith.constant dense<0.000000e+00> : vector<8x32xf32>
    %66 = tpu.matmul %55, %25, %cst_38 {dimension_numbers = #tpu.dot_dimension_numbers<[1], [0], [0], [1], [0, 0, 1, 1], [], []>} : vector<8x32xf32>, vector<32x32xf32>, vector<8x32xf32> -> vector<8x32xf32>
    %67 = arith.addf %57, %66 : vector<8x32xf32>
    %68 = arith.negf %67 : vector<8x32xf32>
    %69 = math.exp %68 : vector<8x32xf32>
    %cst_39 = arith.constant 1.000000e+00 : f32
    %70 = vector.broadcast %cst_39 : f32 to vector<8x32xf32>
    %71 = arith.addf %70, %69 : vector<8x32xf32>
    %72 = arith.divf %70, %71 : vector<8x32xf32>
    %cst_40 = arith.constant dense<0.000000e+00> : vector<8x32xf32>
    %73 = tpu.matmul %55, %27, %cst_40 {dimension_numbers = #tpu.dot_dimension_numbers<[1], [0], [0], [1], [0, 0, 1, 1], [], []>} : vector<8x32xf32>, vector<32x32xf32>, vector<8x32xf32> -> vector<8x32xf32>
    %74 = vector.broadcast %28 : vector<1x32xf32> to vector<8x32xf32>
    %75 = arith.addf %73, %74 : vector<8x32xf32>
    %76 = arith.mulf %65, %75 : vector<8x32xf32>
    %77 = arith.addf %58, %76 : vector<8x32xf32>
    %78 = math.tanh %77 : vector<8x32xf32>
    %79 = arith.subf %55, %78 : vector<8x32xf32>
    %80 = arith.mulf %72, %79 : vector<8x32xf32>
    %81 = arith.addf %78, %80 : vector<8x32xf32>
    %82 = vector.extract_strided_slice %7 {offsets = [16, 0], sizes = [8, 32], strides = [1, 1]} : vector<64x32xf32> to vector<8x32xf32>
    %83 = vector.extract_strided_slice %14 {offsets = [16, 0], sizes = [8, 32], strides = [1, 1]} : vector<64x32xf32> to vector<8x32xf32>
    %84 = vector.extract_strided_slice %21 {offsets = [16, 0], sizes = [8, 32], strides = [1, 1]} : vector<64x32xf32> to vector<8x32xf32>
    %cst_41 = arith.constant dense<0.000000e+00> : vector<8x32xf32>
    %85 = tpu.matmul %81, %23, %cst_41 {dimension_numbers = #tpu.dot_dimension_numbers<[1], [0], [0], [1], [0, 0, 1, 1], [], []>} : vector<8x32xf32>, vector<32x32xf32>, vector<8x32xf32> -> vector<8x32xf32>
    %86 = arith.addf %82, %85 : vector<8x32xf32>
    %87 = arith.negf %86 : vector<8x32xf32>
    %88 = math.exp %87 : vector<8x32xf32>
    %cst_42 = arith.constant 1.000000e+00 : f32
    %89 = vector.broadcast %cst_42 : f32 to vector<8x32xf32>
    %90 = arith.addf %89, %88 : vector<8x32xf32>
    %91 = arith.divf %89, %90 : vector<8x32xf32>
    %cst_43 = arith.constant dense<0.000000e+00> : vector<8x32xf32>
    %92 = tpu.matmul %81, %25, %cst_43 {dimension_numbers = #tpu.dot_dimension_numbers<[1], [0], [0], [1], [0, 0, 1, 1], [], []>} : vector<8x32xf32>, vector<32x32xf32>, vector<8x32xf32> -> vector<8x32xf32>
    %93 = arith.addf %83, %92 : vector<8x32xf32>
    %94 = arith.negf %93 : vector<8x32xf32>
    %95 = math.exp %94 : vector<8x32xf32>
    %cst_44 = arith.constant 1.000000e+00 : f32
    %96 = vector.broadcast %cst_44 : f32 to vector<8x32xf32>
    %97 = arith.addf %96, %95 : vector<8x32xf32>
    %98 = arith.divf %96, %97 : vector<8x32xf32>
    %cst_45 = arith.constant dense<0.000000e+00> : vector<8x32xf32>
    %99 = tpu.matmul %81, %27, %cst_45 {dimension_numbers = #tpu.dot_dimension_numbers<[1], [0], [0], [1], [0, 0, 1, 1], [], []>} : vector<8x32xf32>, vector<32x32xf32>, vector<8x32xf32> -> vector<8x32xf32>
    %100 = vector.broadcast %28 : vector<1x32xf32> to vector<8x32xf32>
    %101 = arith.addf %99, %100 : vector<8x32xf32>
    %102 = arith.mulf %91, %101 : vector<8x32xf32>
    %103 = arith.addf %84, %102 : vector<8x32xf32>
    %104 = math.tanh %103 : vector<8x32xf32>
    %105 = arith.subf %81, %104 : vector<8x32xf32>
    %106 = arith.mulf %98, %105 : vector<8x32xf32>
    %107 = arith.addf %104, %106 : vector<8x32xf32>
    %108 = vector.extract_strided_slice %7 {offsets = [24, 0], sizes = [8, 32], strides = [1, 1]} : vector<64x32xf32> to vector<8x32xf32>
    %109 = vector.extract_strided_slice %14 {offsets = [24, 0], sizes = [8, 32], strides = [1, 1]} : vector<64x32xf32> to vector<8x32xf32>
    %110 = vector.extract_strided_slice %21 {offsets = [24, 0], sizes = [8, 32], strides = [1, 1]} : vector<64x32xf32> to vector<8x32xf32>
    %cst_46 = arith.constant dense<0.000000e+00> : vector<8x32xf32>
    %111 = tpu.matmul %107, %23, %cst_46 {dimension_numbers = #tpu.dot_dimension_numbers<[1], [0], [0], [1], [0, 0, 1, 1], [], []>} : vector<8x32xf32>, vector<32x32xf32>, vector<8x32xf32> -> vector<8x32xf32>
    %112 = arith.addf %108, %111 : vector<8x32xf32>
    %113 = arith.negf %112 : vector<8x32xf32>
    %114 = math.exp %113 : vector<8x32xf32>
    %cst_47 = arith.constant 1.000000e+00 : f32
    %115 = vector.broadcast %cst_47 : f32 to vector<8x32xf32>
    %116 = arith.addf %115, %114 : vector<8x32xf32>
    %117 = arith.divf %115, %116 : vector<8x32xf32>
    %cst_48 = arith.constant dense<0.000000e+00> : vector<8x32xf32>
    %118 = tpu.matmul %107, %25, %cst_48 {dimension_numbers = #tpu.dot_dimension_numbers<[1], [0], [0], [1], [0, 0, 1, 1], [], []>} : vector<8x32xf32>, vector<32x32xf32>, vector<8x32xf32> -> vector<8x32xf32>
    %119 = arith.addf %109, %118 : vector<8x32xf32>
    %120 = arith.negf %119 : vector<8x32xf32>
    %121 = math.exp %120 : vector<8x32xf32>
    %cst_49 = arith.constant 1.000000e+00 : f32
    %122 = vector.broadcast %cst_49 : f32 to vector<8x32xf32>
    %123 = arith.addf %122, %121 : vector<8x32xf32>
    %124 = arith.divf %122, %123 : vector<8x32xf32>
    %cst_50 = arith.constant dense<0.000000e+00> : vector<8x32xf32>
    %125 = tpu.matmul %107, %27, %cst_50 {dimension_numbers = #tpu.dot_dimension_numbers<[1], [0], [0], [1], [0, 0, 1, 1], [], []>} : vector<8x32xf32>, vector<32x32xf32>, vector<8x32xf32> -> vector<8x32xf32>
    %126 = vector.broadcast %28 : vector<1x32xf32> to vector<8x32xf32>
    %127 = arith.addf %125, %126 : vector<8x32xf32>
    %128 = arith.mulf %117, %127 : vector<8x32xf32>
    %129 = arith.addf %110, %128 : vector<8x32xf32>
    %130 = math.tanh %129 : vector<8x32xf32>
    %131 = arith.subf %107, %130 : vector<8x32xf32>
    %132 = arith.mulf %124, %131 : vector<8x32xf32>
    %133 = arith.addf %130, %132 : vector<8x32xf32>
    %134 = vector.extract_strided_slice %7 {offsets = [32, 0], sizes = [8, 32], strides = [1, 1]} : vector<64x32xf32> to vector<8x32xf32>
    %135 = vector.extract_strided_slice %14 {offsets = [32, 0], sizes = [8, 32], strides = [1, 1]} : vector<64x32xf32> to vector<8x32xf32>
    %136 = vector.extract_strided_slice %21 {offsets = [32, 0], sizes = [8, 32], strides = [1, 1]} : vector<64x32xf32> to vector<8x32xf32>
    %cst_51 = arith.constant dense<0.000000e+00> : vector<8x32xf32>
    %137 = tpu.matmul %133, %23, %cst_51 {dimension_numbers = #tpu.dot_dimension_numbers<[1], [0], [0], [1], [0, 0, 1, 1], [], []>} : vector<8x32xf32>, vector<32x32xf32>, vector<8x32xf32> -> vector<8x32xf32>
    %138 = arith.addf %134, %137 : vector<8x32xf32>
    %139 = arith.negf %138 : vector<8x32xf32>
    %140 = math.exp %139 : vector<8x32xf32>
    %cst_52 = arith.constant 1.000000e+00 : f32
    %141 = vector.broadcast %cst_52 : f32 to vector<8x32xf32>
    %142 = arith.addf %141, %140 : vector<8x32xf32>
    %143 = arith.divf %141, %142 : vector<8x32xf32>
    %cst_53 = arith.constant dense<0.000000e+00> : vector<8x32xf32>
    %144 = tpu.matmul %133, %25, %cst_53 {dimension_numbers = #tpu.dot_dimension_numbers<[1], [0], [0], [1], [0, 0, 1, 1], [], []>} : vector<8x32xf32>, vector<32x32xf32>, vector<8x32xf32> -> vector<8x32xf32>
    %145 = arith.addf %135, %144 : vector<8x32xf32>
    %146 = arith.negf %145 : vector<8x32xf32>
    %147 = math.exp %146 : vector<8x32xf32>
    %cst_54 = arith.constant 1.000000e+00 : f32
    %148 = vector.broadcast %cst_54 : f32 to vector<8x32xf32>
    %149 = arith.addf %148, %147 : vector<8x32xf32>
    %150 = arith.divf %148, %149 : vector<8x32xf32>
    %cst_55 = arith.constant dense<0.000000e+00> : vector<8x32xf32>
    %151 = tpu.matmul %133, %27, %cst_55 {dimension_numbers = #tpu.dot_dimension_numbers<[1], [0], [0], [1], [0, 0, 1, 1], [], []>} : vector<8x32xf32>, vector<32x32xf32>, vector<8x32xf32> -> vector<8x32xf32>
    %152 = vector.broadcast %28 : vector<1x32xf32> to vector<8x32xf32>
    %153 = arith.addf %151, %152 : vector<8x32xf32>
    %154 = arith.mulf %143, %153 : vector<8x32xf32>
    %155 = arith.addf %136, %154 : vector<8x32xf32>
    %156 = math.tanh %155 : vector<8x32xf32>
    %157 = arith.subf %133, %156 : vector<8x32xf32>
    %158 = arith.mulf %150, %157 : vector<8x32xf32>
    %159 = arith.addf %156, %158 : vector<8x32xf32>
    %160 = vector.extract_strided_slice %7 {offsets = [40, 0], sizes = [8, 32], strides = [1, 1]} : vector<64x32xf32> to vector<8x32xf32>
    %161 = vector.extract_strided_slice %14 {offsets = [40, 0], sizes = [8, 32], strides = [1, 1]} : vector<64x32xf32> to vector<8x32xf32>
    %162 = vector.extract_strided_slice %21 {offsets = [40, 0], sizes = [8, 32], strides = [1, 1]} : vector<64x32xf32> to vector<8x32xf32>
    %cst_56 = arith.constant dense<0.000000e+00> : vector<8x32xf32>
    %163 = tpu.matmul %159, %23, %cst_56 {dimension_numbers = #tpu.dot_dimension_numbers<[1], [0], [0], [1], [0, 0, 1, 1], [], []>} : vector<8x32xf32>, vector<32x32xf32>, vector<8x32xf32> -> vector<8x32xf32>
    %164 = arith.addf %160, %163 : vector<8x32xf32>
    %165 = arith.negf %164 : vector<8x32xf32>
    %166 = math.exp %165 : vector<8x32xf32>
    %cst_57 = arith.constant 1.000000e+00 : f32
    %167 = vector.broadcast %cst_57 : f32 to vector<8x32xf32>
    %168 = arith.addf %167, %166 : vector<8x32xf32>
    %169 = arith.divf %167, %168 : vector<8x32xf32>
    %cst_58 = arith.constant dense<0.000000e+00> : vector<8x32xf32>
    %170 = tpu.matmul %159, %25, %cst_58 {dimension_numbers = #tpu.dot_dimension_numbers<[1], [0], [0], [1], [0, 0, 1, 1], [], []>} : vector<8x32xf32>, vector<32x32xf32>, vector<8x32xf32> -> vector<8x32xf32>
    %171 = arith.addf %161, %170 : vector<8x32xf32>
    %172 = arith.negf %171 : vector<8x32xf32>
    %173 = math.exp %172 : vector<8x32xf32>
    %cst_59 = arith.constant 1.000000e+00 : f32
    %174 = vector.broadcast %cst_59 : f32 to vector<8x32xf32>
    %175 = arith.addf %174, %173 : vector<8x32xf32>
    %176 = arith.divf %174, %175 : vector<8x32xf32>
    %cst_60 = arith.constant dense<0.000000e+00> : vector<8x32xf32>
    %177 = tpu.matmul %159, %27, %cst_60 {dimension_numbers = #tpu.dot_dimension_numbers<[1], [0], [0], [1], [0, 0, 1, 1], [], []>} : vector<8x32xf32>, vector<32x32xf32>, vector<8x32xf32> -> vector<8x32xf32>
    %178 = vector.broadcast %28 : vector<1x32xf32> to vector<8x32xf32>
    %179 = arith.addf %177, %178 : vector<8x32xf32>
    %180 = arith.mulf %169, %179 : vector<8x32xf32>
    %181 = arith.addf %162, %180 : vector<8x32xf32>
    %182 = math.tanh %181 : vector<8x32xf32>
    %183 = arith.subf %159, %182 : vector<8x32xf32>
    %184 = arith.mulf %176, %183 : vector<8x32xf32>
    %185 = arith.addf %182, %184 : vector<8x32xf32>
    %186 = vector.extract_strided_slice %7 {offsets = [48, 0], sizes = [8, 32], strides = [1, 1]} : vector<64x32xf32> to vector<8x32xf32>
    %187 = vector.extract_strided_slice %14 {offsets = [48, 0], sizes = [8, 32], strides = [1, 1]} : vector<64x32xf32> to vector<8x32xf32>
    %188 = vector.extract_strided_slice %21 {offsets = [48, 0], sizes = [8, 32], strides = [1, 1]} : vector<64x32xf32> to vector<8x32xf32>
    %cst_61 = arith.constant dense<0.000000e+00> : vector<8x32xf32>
    %189 = tpu.matmul %185, %23, %cst_61 {dimension_numbers = #tpu.dot_dimension_numbers<[1], [0], [0], [1], [0, 0, 1, 1], [], []>} : vector<8x32xf32>, vector<32x32xf32>, vector<8x32xf32> -> vector<8x32xf32>
    %190 = arith.addf %186, %189 : vector<8x32xf32>
    %191 = arith.negf %190 : vector<8x32xf32>
    %192 = math.exp %191 : vector<8x32xf32>
    %cst_62 = arith.constant 1.000000e+00 : f32
    %193 = vector.broadcast %cst_62 : f32 to vector<8x32xf32>
    %194 = arith.addf %193, %192 : vector<8x32xf32>
    %195 = arith.divf %193, %194 : vector<8x32xf32>
    %cst_63 = arith.constant dense<0.000000e+00> : vector<8x32xf32>
    %196 = tpu.matmul %185, %25, %cst_63 {dimension_numbers = #tpu.dot_dimension_numbers<[1], [0], [0], [1], [0, 0, 1, 1], [], []>} : vector<8x32xf32>, vector<32x32xf32>, vector<8x32xf32> -> vector<8x32xf32>
    %197 = arith.addf %187, %196 : vector<8x32xf32>
    %198 = arith.negf %197 : vector<8x32xf32>
    %199 = math.exp %198 : vector<8x32xf32>
    %cst_64 = arith.constant 1.000000e+00 : f32
    %200 = vector.broadcast %cst_64 : f32 to vector<8x32xf32>
    %201 = arith.addf %200, %199 : vector<8x32xf32>
    %202 = arith.divf %200, %201 : vector<8x32xf32>
    %cst_65 = arith.constant dense<0.000000e+00> : vector<8x32xf32>
    %203 = tpu.matmul %185, %27, %cst_65 {dimension_numbers = #tpu.dot_dimension_numbers<[1], [0], [0], [1], [0, 0, 1, 1], [], []>} : vector<8x32xf32>, vector<32x32xf32>, vector<8x32xf32> -> vector<8x32xf32>
    %204 = vector.broadcast %28 : vector<1x32xf32> to vector<8x32xf32>
    %205 = arith.addf %203, %204 : vector<8x32xf32>
    %206 = arith.mulf %195, %205 : vector<8x32xf32>
    %207 = arith.addf %188, %206 : vector<8x32xf32>
    %208 = math.tanh %207 : vector<8x32xf32>
    %209 = arith.subf %185, %208 : vector<8x32xf32>
    %210 = arith.mulf %202, %209 : vector<8x32xf32>
    %211 = arith.addf %208, %210 : vector<8x32xf32>
    %212 = vector.extract_strided_slice %7 {offsets = [56, 0], sizes = [8, 32], strides = [1, 1]} : vector<64x32xf32> to vector<8x32xf32>
    %213 = vector.extract_strided_slice %14 {offsets = [56, 0], sizes = [8, 32], strides = [1, 1]} : vector<64x32xf32> to vector<8x32xf32>
    %214 = vector.extract_strided_slice %21 {offsets = [56, 0], sizes = [8, 32], strides = [1, 1]} : vector<64x32xf32> to vector<8x32xf32>
    %cst_66 = arith.constant dense<0.000000e+00> : vector<8x32xf32>
    %215 = tpu.matmul %211, %23, %cst_66 {dimension_numbers = #tpu.dot_dimension_numbers<[1], [0], [0], [1], [0, 0, 1, 1], [], []>} : vector<8x32xf32>, vector<32x32xf32>, vector<8x32xf32> -> vector<8x32xf32>
    %216 = arith.addf %212, %215 : vector<8x32xf32>
    %217 = arith.negf %216 : vector<8x32xf32>
    %218 = math.exp %217 : vector<8x32xf32>
    %cst_67 = arith.constant 1.000000e+00 : f32
    %219 = vector.broadcast %cst_67 : f32 to vector<8x32xf32>
    %220 = arith.addf %219, %218 : vector<8x32xf32>
    %221 = arith.divf %219, %220 : vector<8x32xf32>
    %cst_68 = arith.constant dense<0.000000e+00> : vector<8x32xf32>
    %222 = tpu.matmul %211, %25, %cst_68 {dimension_numbers = #tpu.dot_dimension_numbers<[1], [0], [0], [1], [0, 0, 1, 1], [], []>} : vector<8x32xf32>, vector<32x32xf32>, vector<8x32xf32> -> vector<8x32xf32>
    %223 = arith.addf %213, %222 : vector<8x32xf32>
    %224 = arith.negf %223 : vector<8x32xf32>
    %225 = math.exp %224 : vector<8x32xf32>
    %cst_69 = arith.constant 1.000000e+00 : f32
    %226 = vector.broadcast %cst_69 : f32 to vector<8x32xf32>
    %227 = arith.addf %226, %225 : vector<8x32xf32>
    %228 = arith.divf %226, %227 : vector<8x32xf32>
    %cst_70 = arith.constant dense<0.000000e+00> : vector<8x32xf32>
    %229 = tpu.matmul %211, %27, %cst_70 {dimension_numbers = #tpu.dot_dimension_numbers<[1], [0], [0], [1], [0, 0, 1, 1], [], []>} : vector<8x32xf32>, vector<32x32xf32>, vector<8x32xf32> -> vector<8x32xf32>
    %230 = vector.broadcast %28 : vector<1x32xf32> to vector<8x32xf32>
    %231 = arith.addf %229, %230 : vector<8x32xf32>
    %232 = arith.mulf %221, %231 : vector<8x32xf32>
    %233 = arith.addf %214, %232 : vector<8x32xf32>
    %234 = math.tanh %233 : vector<8x32xf32>
    %235 = arith.subf %211, %234 : vector<8x32xf32>
    %236 = arith.mulf %228, %235 : vector<8x32xf32>
    %237 = arith.addf %234, %236 : vector<8x32xf32>
    %c0_71 = arith.constant 0 : index
    %c0_72 = arith.constant 0 : index
    %238 = vector.load %arg5[%c0_71, %c0_72] : memref<32x4xf32, #tpu.memory_space<vmem>>, vector<32x4xf32>
    %cst_73 = arith.constant dense<0.000000e+00> : vector<8x4xf32>
    %239 = tpu.matmul %237, %238, %cst_73 {dimension_numbers = #tpu.dot_dimension_numbers<[1], [0], [0], [1], [0, 0, 1, 1], [], []>} : vector<8x32xf32>, vector<32x4xf32>, vector<8x4xf32> -> vector<8x4xf32>
    %c0_74 = arith.constant 0 : index
    %c0_75 = arith.constant 0 : index
    %240 = vector.load %arg6[%c0_74, %c0_75] : memref<1x4xf32, #tpu.memory_space<vmem>>, vector<1x4xf32>
    %241 = vector.broadcast %240 : vector<1x4xf32> to vector<8x4xf32>
    %242 = arith.addf %239, %241 : vector<8x4xf32>
    %c0_76 = arith.constant 0 : index
    %c0_77 = arith.constant 0 : index
    %243 = vector.load %arg7[%c0_76, %c0_77] : memref<8x4xf32, #tpu.memory_space<vmem>>, vector<8x4xf32>
    tpu.vector_store %arg7[%c0_76, %c0_77], %242 {strides = array<i32>} : memref<8x4xf32, #tpu.memory_space<vmem>>, vector<8x4xf32>,
    return
  }
}

</mosaic_0001>

<bundles_post_ra>
// kernel: tpu_custom_call.1
= control target key start
LH: loop header
LB: loop body
LE: loop exit
PB: predicated region body
PF: predicated region fallthrough
CT: control target
= control target key end

     0   :  { %12 = vsyncpa [#allocation3], 0  ;;  %s3258_s24 = smov [#allocation2]   ;;  %s3693_s0 = inlined_call_operand.vmem [shape: f32[64,32], index: 0, kind: input, shape index: {}]   ;;  %s3694_s1 = inlined_call_operand.vmem [shape: f32[3,32,32], index: 1, kind: input, shape index: {}]   ;;  %s3695_s2 = inlined_call_operand.hbm [shape: f32[3,32,32], index: 2, kind: input, shape index: {}]   ;;  %s3696_s3 = inlined_call_operand.vmem [shape: f32[3,1,32], index: 3, kind: input, shape index: {}]   ;;  %s3697_s4 = inlined_call_operand.vmem [shape: f32[1,32], index: 4, kind: input, shape index: {}]   ;;  %s3698_s5 = inlined_call_operand.vmem [shape: f32[32,4], index: 5, kind: input, shape index: {}]   ;;  %s3699_s6 = inlined_call_operand.vmem [shape: f32[1,4], index: 6, kind: input, shape index: {}]   ;;  %s3700_s7 = inlined_call_operand.vmem [shape: f32[8,4], index: 7, kind: output, shape index: {}]  }
   0x1   :  { %s22_s25 = sshll.u32 %s3258_s24, 4  ;;  %s3234_s28 = scalar_lea.hbm %s3695_s2, 1536  ;;  %s23_s25 = int_to_ptr.vmem [resolvable:$true] %s22_s25 }
   0x2   :  { %p3235_p0 = scmp.ne.s32.totalorder %s3695_s2, %s3234_s28  ;;  %p3238_p1 = scmp.lt.u32.totalorder %s3234_s28, %s3695_s2 }
   0x4   :  { %p3240_p2 = pnand %p3238_p1, %p3235_p0 }
   0x6   :  { %3243 = shalt.err (!%p3240_p2)
}
   0x7   :  { %s3244_s10 = scalar_lea.vmem %s23_s25, 1536  ;;  %p3249_p4 = scmp.lt.s32.totalorder %s23_s25, %s23_s25 }
   0x8   :  { %p3245_p3 = scmp.ne.s32.totalorder %s23_s25, %s3244_s10  ;;  %p3250_p5 = scmp.lt.s32.totalorder %s3244_s10, %s3244_s10 }
   0xa   :  { %p3251_p6 = por %p3250_p5, %p3249_p4 }
   0xc   :  { %p3252_p7 = pnand %p3251_p6, %p3245_p3 }
   0xe   :  { %3255 = shalt.err (!%p3252_p7)
}
   0xf   :  { %s3259_s11 = smov 128   ;;  %s3260_s12 = smov 8  }
  0x10   :  { %28 = dma.hbm_to_vmem [thread:$0]  %s3695_s2, 1536, %s23_s25, [#allocation3], %s3259_s11, %s3259_s11, %s3260_s12  }
  0x11   :  { %3256 = dma.done.wait [#allocation3], 1536  }
  0x12   :  { %3257 = vsyncadd [#allocation3], 4294965760  ;;  %vm59_vm0 = vcmask 261120   ;;  %v2410_v0 = vld [vmem:[%s3694_s1 + $0x20] sm:$0xff]  ;;  %v2411_v1 = vld [vmem:[%s3694_s1 + $0x28] sm:$0xff]  ;;  %v3261_v19 = vmov 0.0|0.0  }
  0x13   :  { %v2412_v2 = vld [vmem:[%s3694_s1 + $0x30] sm:$0xff]  ;;  %v2982_v3 = vpack.c.bf16 %v2411_v1, %v2410_v0  ;;  %v2413_v4 = vld [vmem:[%s3694_s1 + $0x38] sm:$0xff]  ;;  %v3331_v5 = vld [vmem:[%s3693_s0] sm:$0xff]  ;;  %vm3262_vm1 = vmmov 0   ;;  %v3263_v35 = vmov 0.0   ;;  %vm2394_vm2 = vcmask 31744  }
  0x14   :  { %v2986_v6 = vpack.c.bf16 %v2413_v4, %v2412_v2  ;;  %2667 = vmatprep.mubr.msk.f32.mxu1 %vm59_vm0, %v3331_v5  ;;  %v48_v7 = vld [vmem:[%s3694_s1] sm:$0xff]  ;;  %2647 = vmatprep.mubr.msk.f32.mxu0 %vm59_vm0, %v3331_v5  ;;  %v49_v8 = vld [vmem:[%s3694_s1 + $0x8] sm:$0xff]  ;;  %v50_v10 = vld [vmem:[%s3694_s1 + $0x10] sm:$0xff] }
  0x15   :  { %2983 = vmatprep.subr.bf16.mxu1 %v2982_v3  ;;  %v2974_v9 = vpack.c.bf16 %v49_v8, %v48_v7  ;;  %v51_v11 = vld [vmem:[%s3694_s1 + $0x18] sm:$0xff]  ;;  %v425_v12 = vld [vmem:[#allocation2] sm:$0xff]  ;;  %v426_v13 = vld [vmem:[#allocation2 + $0x8] sm:$0xff] }
  0x16   :  { %2985 = vmatpush3.bf16.msra.mxu1 %v2982_v3  ;;  %v2978_v14 = vpack.c.bf16 %v51_v11, %v50_v10  ;;  %v2424_v15 = vld [vmem:[%s3694_s1 + $0x40] sm:$0xff]  ;;  %v2425_v16 = vld [vmem:[%s3694_s1 + $0x48] sm:$0xff]  ;;  %v3358_v18 = vpack.c.bf16 %v426_v13, %v425_v12  ;;  %v42_v20 = vld [vmem:[%s3693_s0 + $0x10] sm:$0xff] }
  0x17   :  { %2987 = vmatprep.subr.bf16.mxu1 %v2986_v6  ;;  %2975 = vmatprep.subr.bf16.mxu0 %v2974_v9  ;;  %v41_v17 = vld [vmem:[%s3693_s0 + $0x8] sm:$0xff]  ;;  %v427_v21 = vld [vmem:[#allocation2 + $0x10] sm:$0xff]  ;;  %v428_v22 = vld [vmem:[#allocation2 + $0x18] sm:$0xff]  ;;  %v2990_v23 = vpack.c.bf16 %v2425_v16, %v2424_v15 }
  0x18   :  { %2977 = vmatpush3.bf16.msra.mxu0 %v2974_v9  ;;  %v2426_v24 = vld [vmem:[%s3694_s1 + $0x50] sm:$0xff]  ;;  %v2427_v25 = vld [vmem:[%s3694_s1 + $0x58] sm:$0xff]  ;;  %v3376_v27 = vpack.c.bf16 %v428_v22, %v427_v21  ;;  %v44_v28 = vld [vmem:[%s3693_s0 + $0x20] sm:$0xff] }
  0x19   :  { %2979 = vmatprep.subr.bf16.mxu0 %v2978_v14  ;;  %v43_v26 = vld [vmem:[%s3693_s0 + $0x18] sm:$0xff]  ;;  %v2994_v29 = vpack.c.bf16 %v2427_v25, %v2426_v24  ;;  %v45_v30 = vld [vmem:[%s3693_s0 + $0x28] sm:$0xff]  ;;  %v46_v31 = vld [vmem:[%s3693_s0 + $0x30] sm:$0xff] }
  0x1a   :  { %2989 = vmatpush3.bf16.msra.mxu1 %v2986_v6  ;;  %v47_v32 = vld [vmem:[%s3693_s0 + $0x38] sm:$0xff]  ;;  %v430_v33 = vld [vmem:[#allocation2 + $0x20] sm:$0xff]  ;;  %v431_v34 = vld [vmem:[#allocation2 + $0x28] sm:$0xff] }
  0x1b   :  { %2998 = vmatprep.subr.bf16.mxu1 %v3261_v19  ;;  %v3407_v36 = vpack.c.bf16 %v431_v34, %v430_v33  ;;  %v435_v37 = vld [vmem:[#allocation2 + $0x40] sm:$0xff]  ;;  %v436_v38 = vld [vmem:[#allocation2 + $0x48] sm:$0xff]  ;;  %v432_v39 = vld [vmem:[#allocation2 + $0x30] sm:$0xff] }
  0x1c   :  { %2981 = vmatpush3.bf16.msra.mxu0 %v2978_v14  ;;  %v433_v40 = vld [vmem:[#allocation2 + $0x38] sm:$0xff]  ;;  %v3413_v41 = vpack.c.bf16 %v436_v38, %v435_v37  ;;  %v437_v43 = vld [vmem:[#allocation2 + $0x50] sm:$0xff]  ;;  %v2415_v46 = vld [vmem:[%s3696_s3 + $0x1] ss:$0 sm:$0xff] }
  0x1d   :  { %2668 = vmatmul.mubr.msk.f32.vlgmr.msra.gmra.mrb[0].mxu1 %vm59_vm0, %v41_v17  ;;  %2991 = vmatprep.subr.bf16.mxu0 %v2990_v23  ;;  %v3416_v42 = vpack.c.bf16 %v433_v40, %v432_v39  ;;  %v438_v44 = vld [vmem:[#allocation2 + $0x58] sm:$0xff]  ;;  %v2401_v50 = vld [vmem:[%s3696_s3] ss:$0 sm:$0xff] }
  0x1e   :  { %3000 = vmatpush3.bf16.msra.mxu1 %v3358_v18  ;;  %2670 = vmatprep.mubr.msk.f32.mxu1 %vm59_vm0, %v42_v20  ;;  %v3426_v45 = vpack.c.bf16 %v438_v44, %v437_v43 }
  0x1f   :  { %3001 = vmatprep.subr.bf16.mxu1 %v3261_v19  ;;  %2648 = vmatmul.mubr.msk.f32.vlgmr.msra.gmra.mrb[0].mxu0 %vm59_vm0, %v41_v17 }
  0x20   :  { %2993 = vmatpush3.bf16.msra.mxu0 %v2990_v23  ;;  %2650 = vmatprep.mubr.msk.f32.mxu0 %vm59_vm0, %v42_v20 }
  0x21   :  { %2671 = vmatmul.mubr.msk.f32.gmra.mrb[2].mxu1 %vm59_vm0, %v43_v26  ;;  %2995 = vmatprep.subr.bf16.mxu0 %v2994_v29 }
  0x22   :  { %2673 = vmatprep.mubr.msk.f32.mxu1 %vm59_vm0, %v44_v28  ;;  %3003 = vmatpush3.bf16.msra.mxu1 %v3376_v27 }
  0x23   :  { %3004 = vmatprep.subr.bf16.mxu1 %v3261_v19  ;;  %2651 = vmatmul.mubr.msk.f32.gmra.mrb[2].mxu0 %vm59_vm0, %v43_v26 }
  0x24   :  { %2653 = vmatprep.mubr.msk.f32.mxu0 %vm59_vm0, %v44_v28  ;;  %2997 = vmatpush3.bf16.msra.mxu0 %v2994_v29 }
  0x25   :  { %2674 = vmatmul.mubr.msk.f32.gmra.mrb[4].mxu1 %vm59_vm0, %v45_v30  ;;  %3010 = vmatprep.subr.bf16.mxu0 %v3261_v19 }
  0x26   :  { %2676 = vmatprep.mubr.msk.f32.mxu1 %vm59_vm0, %v46_v31 }
  0x27   :  { %2654 = vmatmul.mubr.msk.f32.gmra.mrb[4].mxu0 %vm59_vm0, %v45_v30 }
  0x28   :  { %2656 = vmatprep.mubr.msk.f32.mxu0 %vm59_vm0, %v46_v31 }
  0x29   :  { %2677 = vmatmul.mubr.msk.f32.gmra.mrb[6].mxu1 %vm59_vm0, %v47_v32 }
  0x2a   :  { %2707 = vmatprep.mubr.msk.f32.mxu1 %vm3262_vm1, %v3263_v35 }
  0x2b   :  { %2657 = vmatmul.mubr.msk.f32.gmra.mrb[6].mxu0 %vm59_vm0, %v47_v32 }
  0x2c   :  { %2687 = vmatprep.mubr.msk.f32.mxu0 %vm59_vm0, %v3331_v5 }
  0x2d   :  { %2708 = vmatmul.mubr.f32.vlgmr.msra.gmra.mrb[8].mxu1 %v3263_v35 }
  0x2e   :  { %3006 = vmatpush3.bf16.msra.mxu1 %v3407_v36  ;;  %2718 = vmatprep.mubr.msk.f32.mxu1 %vm3262_vm1, %v3263_v35 }
  0x2f   :  { %3007 = vmatprep.subr.bf16.mxu1 %v3261_v19  ;;  %2688 = vmatmul.mubr.msk.f32.vlgmr.msra.gmra.mrb[8].mxu0 %vm59_vm0, %v41_v17 }
  0x30   :  { %3012 = vmatpush3.bf16.msra.mxu0 %v3413_v41  ;;  %2690 = vmatprep.mubr.msk.f32.mxu0 %vm59_vm0, %v42_v20  ;;  %v2429_v20 = vld [vmem:[%s3696_s3 + $0x2] ss:$0 sm:$0xff] }
  0x31   :  { %3013 = vmatprep.subr.bf16.mxu0 %v3261_v19 }
  0x32   :  { %3009 = vmatpush3.bf16.msra.mxu1 %v3416_v42 }
  0x33   :  { %3016 = vmatprep.subr.bf16.mxu1 %v3261_v19  ;;  %2691 = vmatmul.mubr.msk.f32.gmra.mrb[10].mxu0 %vm59_vm0, %v43_v26 }
  0x34   :  { %2693 = vmatprep.mubr.msk.f32.mxu0 %vm59_vm0, %v44_v28  ;;  %3015 = vmatpush3.bf16.msra.mxu0 %v3426_v45 }
  0x35   :  { %2719 = vmatmul.mubr.f32.vlgmr.msra.gmra.mrb[10].mxu1 %v3263_v35  ;;  %3022 = vmatprep.subr.bf16.mxu0 %v3261_v19 }
  0x36   :  { %3018 = vmatpush3.bf16.msra.mxu1 %v3358_v18  ;;  %2740 = vmatprep.mubr.msk.f32.mxu1 %vm3262_vm1, %v3263_v35 }
  0x37   :  { %3019 = vmatprep.subr.bf16.mxu1 %v3261_v19  ;;  %2694 = vmatmul.mubr.msk.f32.gmra.mrb[12].mxu0 %vm59_vm0, %v45_v30 }
  0x38   :  { %2696 = vmatprep.mubr.msk.f32.mxu0 %vm59_vm0, %v46_v31 }
  0x3a   :  { %3021 = vmatpush3.bf16.msra.mxu1 %v3376_v27 }
  0x3b   :  { %3028 = vmatprep.subr.bf16.mxu1 %v3261_v19  ;;  %2697 = vmatmul.mubr.msk.f32.gmra.mrb[14].mxu0 %vm59_vm0, %v47_v32 }
  0x3c   :  { %2729 = vmatprep.mubr.msk.f32.mxu0 %vm3262_vm1, %v3263_v35 }
  0x3f   :  { %2730 = vmatmul.mubr.f32.vlgmr.msra.gmra.mrb[16].mxu0 %v3263_v35 }
  0x40   :  { %3024 = vmatpush3.bf16.msra.mxu0 %v3407_v36  ;;  %2751 = vmatprep.mubr.msk.f32.mxu0 %vm3262_vm1, %v3263_v35 }
  0x41   :  { %3025 = vmatprep.subr.bf16.mxu0 %v3261_v19 }
  0x44   :  { %3027 = vmatpush3.bf16.msra.mxu0 %v3416_v42 }
  0x45   :  { %3034 = vmatprep.subr.bf16.mxu0 %v3261_v19 }
  0xf0   :  { %v2669_v47 = vpop.f32.mrb[0].mxu1 }
  0xf1   :  { %v3455_v48 = vadd.f32 %v2669_v47, %v2415_v46  ;;  %v268_v49 = vpop.f32.mrb[1].mxu1 }
  0xf2   :  { %v2649_v51 = vpop.f32.mrb[0].mxu0  ;;  %v269_v25 = vadd.f32 %v2415_v46, %v268_v49 }
  0xf3   :  { %v3460_v53 = vadd.f32 %v2649_v51, %v2401_v50  ;;  %v150_v54 = vpop.f32.mrb[1].mxu0 }
  0xf4   :  { %v2672_v52 = vpop.f32.mrb[2].mxu1  ;;  %v151_v10 = vadd.f32 %v2401_v50, %v150_v54  ;;  %v3506_v54 = vld [vmem:[%s3697_s4] ss:$0 sm:$0xff] }
  0xf5   :  { %v3462_v55 = vadd.f32 %v2672_v52, %v2415_v46  ;;  %v278_v56 = vpop.f32.mrb[3].mxu1 }
  0xf6   :  { %v3464_v57 = vadd.f32 %v2415_v46, %v278_v56  ;;  %v2652_v58 = vpop.f32.mrb[2].mxu0 }
  0xf7   :  { %v3466_v60 = vadd.f32 %v2652_v58, %v2401_v50  ;;  %v160_v61 = vpop.f32.mrb[3].mxu0 }
  0xf8   :  { %v2675_v59 = vpop.f32.mrb[4].mxu1  ;;  %v3470_v0 = vadd.f32 %v2401_v50, %v160_v61 }
  0xf9   :  { %v3468_v62 = vadd.f32 %v2675_v59, %v2415_v46  ;;  %v288_v63 = vpop.f32.mrb[5].mxu1 }
  0xfa   :  { %v3472_v1 = vadd.f32 %v2415_v46, %v288_v63  ;;  %v2655_v2 = vpop.f32.mrb[4].mxu0 }
  0xfb   :  { %v3474_v4 = vadd.f32 %v2655_v2, %v2401_v50  ;;  %v170_v5 = vpop.f32.mrb[5].mxu0 }
  0xfc   :  { %v2678_v3 = vpop.f32.mrb[6].mxu1  ;;  %v3478_v8 = vadd.f32 %v2401_v50, %v170_v5 }
  0xfd   :  { %v3476_v6 = vadd.f32 %v2678_v3, %v2415_v46  ;;  %v298_v7 = vpop.f32.mrb[7].mxu1 }
  0xfe   :  { %v3480_v9 = vadd.f32 %v2415_v46, %v298_v7  ;;  %v2658_v11 = vpop.f32.mrb[6].mxu0 }
  0xff   :  { %v3482_v13 = vadd.f32 %v2658_v11, %v2401_v50  ;;  %v180_v14 = vpop.f32.mrb[7].mxu0 }
 0x100   :  { %v509_v12 = vpop.f32.mrb[8].mxu1  ;;  %v3484_v17 = vadd.f32 %v2401_v50, %v180_v14 }
 0x101   :  { %v513_v15 = vadd.f32 %v509_v12, %v151_v10  ;;  %v2709_v16 = vpop.f32.mrb[9].mxu1 }
 0x102   :  { %v2689_v22 = vpop.f32.mrb[8].mxu0 }
 0x103   :  { %v2438_v21 = vmul.f32 -1.442695, %v513_v15  ;;  %v3489_v23 = vadd.f32 %v2689_v22, %v2429_v20  ;;  %v386_v24 = vpop.f32.mrb[9].mxu0 }
 0x104   :  { %v387_v61 = vadd.f32 %v2429_v20, %v386_v24 }
 0x105   :  { %3154 = vpow2.f32 %v2438_v21 }
 0x106   :  { %v2692_v26 = vpop.f32.mrb[10].mxu0 }
 0x107   :  { %v3491_v29 = vadd.f32 %v2692_v26, %v2429_v20  ;;  %v396_v30 = vpop.f32.mrb[11].mxu0 }
 0x108   :  { %v586_v28 = vpop.f32.mrb[10].mxu1  ;;  %v3493_v32 = vadd.f32 %v2429_v20, %v396_v30 }
 0x109   :  { %v590_v31 = vadd.f32 %v586_v28, %v269_v25  ;;  %v2720_v33 = vpop.f32.mrb[11].mxu1 }
 0x10a   :  { %v2695_v34 = vpop.f32.mrb[12].mxu0 }
 0x10b   :  { %v3495_v37 = vadd.f32 %v2695_v34, %v2429_v20  ;;  %v406_v38 = vpop.f32.mrb[13].mxu0  ;;  %v2439_v39 = vmul.f32 -1.442695, %v590_v31 }
 0x10c   :  { %v3497_v40 = vadd.f32 %v2429_v20, %v406_v38 }
 0x10d   :  { %3156 = vpow2.f32 %v2439_v39 }
 0x10e   :  { %v2698_v44 = vpop.f32.mrb[14].mxu0 }
 0x10f   :  { %v3155_v43 = vpop.eup %3154  ;;  %v3499_v46 = vadd.f32 %v2698_v44, %v2429_v20  ;;  %v416_v49 = vpop.f32.mrb[15].mxu0 }
 0x110   :  { %v517_v47 = vadd.f32 1.0, %v3155_v43  ;;  %v3501_v50 = vadd.f32 %v2429_v20, %v416_v49 }
 0x112   :  { %3158 = vrcp.f32 %v517_v47  ;;  %v669_v51 = vpop.f32.mrb[16].mxu0 }
 0x113   :  { %v2731_v52 = vpop.f32.mrb[17].mxu0  ;;  %v670_v56 = vadd.f32 %v3506_v54, %v669_v51 }
 0x117   :  { %v3157_v58 = vpop.eup %3156 }
 0x118   :  { %v594_v2 = vadd.f32 1.0, %v3157_v58 }
 0x11c   :  { %v3159_v59 = vpop.eup %3158 }
 0x11d   :  { %v673_v63 = vmul.f32 %v3159_v59, %v670_v56 }
 0x11f   :  { %v674_v3 = vadd.f32 %v673_v63, %v387_v61 }
 0x121   :  { %3160 = vtanh.f32 %v674_v3 }
 0x122   :  { %3162 = vrcp.f32 %v594_v2 }
 0x12b   :  { %v3161_v5 = vpop.eup %3160 }
 0x12c   :  { %v676_v7 = vsub.f32 0.0, %v3161_v5  ;;  %v3163_v10 = vpop.eup %3162 }
 0x12e   :  { %v677_v11 = vmul.f32 %v3163_v10, %v676_v7 }
 0x130   :  { %v678_v12 = vadd.f32 %v3161_v5, %v677_v11 }
 0x132   :  { %2741 = vmatmul.mubr.msk.f32.vlgmr.msra.gmra.mrb[12].mxu1 %vm59_vm0, %v678_v12  ;;  %2752 = vmatmul.mubr.msk.f32.vlgmr.msra.gmra.mrb[18].mxu0 %vm59_vm0, %v678_v12 }
 0x133   :  { %3030 = vmatpush3.bf16.msra.mxu1 %v3413_v41  ;;  %2762 = vmatprep.mubr.msk.f32.mxu1 %vm3262_vm1, %v3263_v35 }
 0x134   :  { %3031 = vmatprep.subr.bf16.mxu1 %v3261_v19  ;;  %3036 = vmatpush3.bf16.msra.mxu0 %v3358_v18 }
 0x135   :  { %3037 = vmatprep.subr.bf16.mxu0 %v3261_v19  ;;  %2773 = vmatprep.mubr.msk.f32.mxu0 %vm3262_vm1, %v3263_v35 }
 0x137   :  { %3033 = vmatpush3.bf16.msra.mxu1 %v3426_v45 }
 0x138   :  { %3040 = vmatprep.subr.bf16.mxu1 %v3261_v19  ;;  %3039 = vmatpush3.bf16.msra.mxu0 %v3376_v27 }
 0x139   :  { %3046 = vmatprep.subr.bf16.mxu0 %v3261_v19 }
 0x13a   :  { %2763 = vmatmul.mubr.msk.f32.vlgmr.msra.gmra.mrb[14].mxu1 %vm59_vm0, %v678_v12 }
 0x13b   :  { %3042 = vmatpush3.bf16.msra.mxu1 %v3407_v36  ;;  %2784 = vmatprep.mubr.msk.f32.mxu1 %vm3262_vm1, %v3263_v35 }
 0x13c   :  { %3043 = vmatprep.subr.bf16.mxu1 %v3261_v19 }
 0x13f   :  { %3045 = vmatpush3.bf16.msra.mxu1 %v3416_v42 }
 0x140   :  { %3052 = vmatprep.subr.bf16.mxu1 %v3261_v19 }
 0x205   :  { %v748_v14 = vpop.f32.mrb[12].mxu1  ;;  %v825_v15 = vpop.f32.mrb[18].mxu0 }
 0x206   :  { %v752_v16 = vadd.f32 %v748_v14, %v3460_v53  ;;  %v829_v20 = vadd.f32 %v825_v15, %v3455_v48  ;;  %v2742_v21 = vpop.f32.mrb[13].mxu1  ;;  %v2753_v22 = vpop.f32.mrb[19].mxu0 }
 0x208   :  { %v2442_v24 = vmul.f32 -1.442695, %v752_v16  ;;  %v2444_v28 = vmul.f32 -1.442695, %v829_v20 }
 0x20a   :  { %3164 = vpow2.f32 %v2442_v24 }
 0x20b   :  { %3166 = vpow2.f32 %v2444_v28 }
 0x20d   :  { %v902_v25 = vpop.f32.mrb[14].mxu1 }
 0x20e   :  { %v2764_v26 = vpop.f32.mrb[15].mxu1  ;;  %v903_v34 = vadd.f32 %v3506_v54, %v902_v25 }
 0x214   :  { %v3165_v30 = vpop.eup %3164 }
 0x215   :  { %v756_v31 = vadd.f32 1.0, %v3165_v30  ;;  %v3167_v33 = vpop.eup %3166 }
 0x216   :  { %v833_v43 = vadd.f32 1.0, %v3167_v33 }
 0x217   :  { %3168 = vrcp.f32 %v756_v31 }
 0x221   :  { %v3169_v38 = vpop.eup %3168 }
 0x222   :  { %v906_v39 = vmul.f32 %v3169_v38, %v903_v34 }
 0x224   :  { %v907_v53 = vadd.f32 %v906_v39, %v3489_v23 }
 0x226   :  { %3170 = vtanh.f32 %v907_v53 }
 0x227   :  { %3172 = vrcp.f32 %v833_v43 }
 0x230   :  { %v3171_v48 = vpop.eup %3170 }
 0x231   :  { %v909_v44 = vsub.f32 %v678_v12, %v3171_v48  ;;  %v3173_v47 = vpop.eup %3172 }
 0x233   :  { %v910_v49 = vmul.f32 %v3173_v47, %v909_v44 }
 0x235   :  { %v911_v51 = vadd.f32 %v3171_v48, %v910_v49 }
 0x237   :  { %2774 = vmatmul.mubr.msk.f32.vlgmr.msra.gmra.mrb[20].mxu0 %vm59_vm0, %v911_v51  ;;  %2785 = vmatmul.mubr.msk.f32.vlgmr.msra.gmra.mrb[16].mxu1 %vm59_vm0, %v911_v51 }
 0x238   :  { %3048 = vmatpush3.bf16.msra.mxu0 %v3413_v41  ;;  %2795 = vmatprep.mubr.msk.f32.mxu0 %vm3262_vm1, %v3263_v35 }
 0x239   :  { %3049 = vmatprep.subr.bf16.mxu0 %v3261_v19  ;;  %3054 = vmatpush3.bf16.msra.mxu1 %v3358_v18 }
 0x23a   :  { %3055 = vmatprep.subr.bf16.mxu1 %v3261_v19  ;;  %2806 = vmatprep.mubr.msk.f32.mxu1 %vm3262_vm1, %v3263_v35 }
 0x23c   :  { %3051 = vmatpush3.bf16.msra.mxu0 %v3426_v45 }
 0x23d   :  { %3058 = vmatprep.subr.bf16.mxu0 %v3261_v19  ;;  %3057 = vmatpush3.bf16.msra.mxu1 %v3376_v27 }
 0x23e   :  { %3064 = vmatprep.subr.bf16.mxu1 %v3261_v19 }
 0x23f   :  { %2796 = vmatmul.mubr.msk.f32.vlgmr.msra.gmra.mrb[22].mxu0 %vm59_vm0, %v911_v51 }
 0x240   :  { %3060 = vmatpush3.bf16.msra.mxu0 %v3407_v36  ;;  %2817 = vmatprep.mubr.msk.f32.mxu0 %vm3262_vm1, %v3263_v35 }
 0x241   :  { %3061 = vmatprep.subr.bf16.mxu0 %v3261_v19 }
 0x244   :  { %3063 = vmatpush3.bf16.msra.mxu0 %v3416_v42 }
 0x245   :  { %3070 = vmatprep.subr.bf16.mxu0 %v3261_v19 }
 0x30a   :  { %v981_v23 = vpop.f32.mrb[20].mxu0  ;;  %v1058_v52 = vpop.f32.mrb[16].mxu1 }
 0x30b   :  { %v985_v56 = vadd.f32 %v981_v23, %v3470_v0  ;;  %v1062_v58 = vadd.f32 %v1058_v52, %v3464_v57  ;;  %v2775_v59 = vpop.f32.mrb[21].mxu0  ;;  %v2786_v61 = vpop.f32.mrb[17].mxu1 }
 0x30d   :  { %v2447_v63 = vmul.f32 -1.442695, %v985_v56  ;;  %v2449_v5 = vmul.f32 -1.442695, %v1062_v58 }
 0x30f   :  { %3174 = vpow2.f32 %v2447_v63 }
 0x310   :  { %3176 = vpow2.f32 %v2449_v5 }
 0x312   :  { %v1135_v2 = vpop.f32.mrb[22].mxu0 }
 0x313   :  { %v2797_v3 = vpop.f32.mrb[23].mxu0  ;;  %v1136_v12 = vadd.f32 %v3506_v54, %v1135_v2 }
 0x319   :  { %v3175_v7 = vpop.eup %3174 }
 0x31a   :  { %v989_v10 = vadd.f32 1.0, %v3175_v7  ;;  %v3177_v11 = vpop.eup %3176 }
 0x31b   :  { %v1066_v16 = vadd.f32 1.0, %v3177_v11 }
 0x31c   :  { %3178 = vrcp.f32 %v989_v10 }
 0x326   :  { %v3179_v14 = vpop.eup %3178 }
 0x327   :  { %v1139_v15 = vmul.f32 %v3179_v14, %v1136_v12 }
 0x329   :  { %v1140_v0 = vadd.f32 %v1139_v15, %v3493_v32 }
 0x32b   :  { %3180 = vtanh.f32 %v1140_v0 }
 0x32c   :  { %3182 = vrcp.f32 %v1066_v16 }
 0x335   :  { %v3181_v57 = vpop.eup %3180 }
 0x336   :  { %v1142_v20 = vsub.f32 %v911_v51, %v3181_v57  ;;  %v3183_v21 = vpop.eup %3182 }
 0x338   :  { %v1143_v22 = vmul.f32 %v3183_v21, %v1142_v20 }
 0x33a   :  { %v1144_v24 = vadd.f32 %v3181_v57, %v1143_v22 }
 0x33c   :  { %2807 = vmatmul.mubr.msk.f32.vlgmr.msra.gmra.mrb[18].mxu1 %vm59_vm0, %v1144_v24  ;;  %2818 = vmatmul.mubr.msk.f32.vlgmr.msra.gmra.mrb[24].mxu0 %vm59_vm0, %v1144_v24 }
 0x33d   :  { %3066 = vmatpush3.bf16.msra.mxu1 %v3413_v41  ;;  %2828 = vmatprep.mubr.msk.f32.mxu1 %vm3262_vm1, %v3263_v35 }
 0x33e   :  { %3067 = vmatprep.subr.bf16.mxu1 %v3261_v19  ;;  %3072 = vmatpush3.bf16.msra.mxu0 %v3358_v18 }
 0x33f   :  { %3073 = vmatprep.subr.bf16.mxu0 %v3261_v19  ;;  %2839 = vmatprep.mubr.msk.f32.mxu0 %vm3262_vm1, %v3263_v35 }
 0x341   :  { %3069 = vmatpush3.bf16.msra.mxu1 %v3426_v45 }
 0x342   :  { %3076 = vmatprep.subr.bf16.mxu1 %v3261_v19  ;;  %3075 = vmatpush3.bf16.msra.mxu0 %v3376_v27 }
 0x343   :  { %3082 = vmatprep.subr.bf16.mxu0 %v3261_v19 }
 0x344   :  { %2829 = vmatmul.mubr.msk.f32.vlgmr.msra.gmra.mrb[20].mxu1 %vm59_vm0, %v1144_v24 }
 0x345   :  { %3078 = vmatpush3.bf16.msra.mxu1 %v3407_v36  ;;  %2850 = vmatprep.mubr.msk.f32.mxu1 %vm3262_vm1, %v3263_v35 }
 0x346   :  { %3079 = vmatprep.subr.bf16.mxu1 %v3261_v19 }
 0x349   :  { %3081 = vmatpush3.bf16.msra.mxu1 %v3416_v42 }
 0x34a   :  { %3088 = vmatprep.subr.bf16.mxu1 %v3261_v19 }
 0x40f   :  { %v1214_v32 = vpop.f32.mrb[18].mxu1  ;;  %v1291_v25 = vpop.f32.mrb[24].mxu0 }
 0x410   :  { %v1218_v26 = vadd.f32 %v1214_v32, %v3466_v60  ;;  %v1295_v28 = vadd.f32 %v1291_v25, %v3462_v55  ;;  %v2808_v30 = vpop.f32.mrb[19].mxu1  ;;  %v2819_v31 = vpop.f32.mrb[25].mxu0 }
 0x412   :  { %v2452_v33 = vmul.f32 -1.442695, %v1218_v26  ;;  %v2454_v39 = vmul.f32 -1.442695, %v1295_v28 }
 0x414   :  { %3184 = vpow2.f32 %v2452_v33 }
 0x415   :  { %3186 = vpow2.f32 %v2454_v39 }
 0x417   :  { %v1368_v34 = vpop.f32.mrb[20].mxu1 }
 0x418   :  { %v2830_v38 = vpop.f32.mrb[21].mxu1  ;;  %v1369_v44 = vadd.f32 %v3506_v54, %v1368_v34 }
 0x41e   :  { %v3185_v43 = vpop.eup %3184 }
 0x41f   :  { %v1222_v53 = vadd.f32 1.0, %v3185_v43  ;;  %v3187_v48 = vpop.eup %3186 }
 0x420   :  { %v1299_v51 = vadd.f32 1.0, %v3187_v48 }
 0x421   :  { %3188 = vrcp.f32 %v1222_v53 }
 0x42b   :  { %v3189_v47 = vpop.eup %3188 }
 0x42c   :  { %v1372_v49 = vmul.f32 %v3189_v47, %v1369_v44 }
 0x42e   :  { %v1373_v60 = vadd.f32 %v1372_v49, %v3491_v29 }
 0x430   :  { %3190 = vtanh.f32 %v1373_v60 }
 0x431   :  { %3192 = vrcp.f32 %v1299_v51 }
 0x43a   :  { %v3191_v55 = vpop.eup %3190 }
 0x43b   :  { %v1375_v23 = vsub.f32 %v1144_v24, %v3191_v55  ;;  %v3193_v52 = vpop.eup %3192 }
 0x43d   :  { %v1376_v56 = vmul.f32 %v3193_v52, %v1375_v23 }
 0x43f   :  { %v1377_v58 = vadd.f32 %v3191_v55, %v1376_v56 }
 0x441   :  { %2840 = vmatmul.mubr.msk.f32.vlgmr.msra.gmra.mrb[26].mxu0 %vm59_vm0, %v1377_v58  ;;  %2851 = vmatmul.mubr.msk.f32.vlgmr.msra.gmra.mrb[22].mxu1 %vm59_vm0, %v1377_v58 }
 0x442   :  { %3084 = vmatpush3.bf16.msra.mxu0 %v3413_v41  ;;  %2861 = vmatprep.mubr.msk.f32.mxu0 %vm3262_vm1, %v3263_v35 }
 0x443   :  { %3085 = vmatprep.subr.bf16.mxu0 %v3261_v19  ;;  %3090 = vmatpush3.bf16.msra.mxu1 %v3358_v18 }
 0x444   :  { %3091 = vmatprep.subr.bf16.mxu1 %v3261_v19  ;;  %2872 = vmatprep.mubr.msk.f32.mxu1 %vm3262_vm1, %v3263_v35 }
 0x446   :  { %3087 = vmatpush3.bf16.msra.mxu0 %v3426_v45 }
 0x447   :  { %3094 = vmatprep.subr.bf16.mxu0 %v3261_v19  ;;  %3093 = vmatpush3.bf16.msra.mxu1 %v3376_v27 }
 0x448   :  { %3100 = vmatprep.subr.bf16.mxu1 %v3261_v19 }
 0x449   :  { %2862 = vmatmul.mubr.msk.f32.vlgmr.msra.gmra.mrb[28].mxu0 %vm59_vm0, %v1377_v58 }
 0x44a   :  { %3096 = vmatpush3.bf16.msra.mxu0 %v3407_v36  ;;  %2883 = vmatprep.mubr.msk.f32.mxu0 %vm3262_vm1, %v3263_v35 }
 0x44b   :  { %3097 = vmatprep.subr.bf16.mxu0 %v3261_v19 }
 0x44e   :  { %3099 = vmatpush3.bf16.msra.mxu0 %v3416_v42 }
 0x44f   :  { %3106 = vmatprep.subr.bf16.mxu0 %v3261_v19 }
 0x514   :  { %v1447_v29 = vpop.f32.mrb[26].mxu0  ;;  %v1524_v59 = vpop.f32.mrb[22].mxu1 }
 0x515   :  { %v1451_v61 = vadd.f32 %v1447_v29, %v3478_v8  ;;  %v1528_v63 = vadd.f32 %v1524_v59, %v3472_v1  ;;  %v2841_v2 = vpop.f32.mrb[27].mxu0  ;;  %v2852_v3 = vpop.f32.mrb[23].mxu1 }
 0x517   :  { %v2457_v5 = vmul.f32 -1.442695, %v1451_v61  ;;  %v2459_v11 = vmul.f32 -1.442695, %v1528_v63 }
 0x519   :  { %3194 = vpow2.f32 %v2457_v5 }
 0x51a   :  { %3196 = vpow2.f32 %v2459_v11 }
 0x51c   :  { %v1601_v7 = vpop.f32.mrb[28].mxu0 }
 0x51d   :  { %v2863_v10 = vpop.f32.mrb[29].mxu0  ;;  %v1602_v16 = vadd.f32 %v3506_v54, %v1601_v7 }
 0x523   :  { %v3195_v12 = vpop.eup %3194 }
 0x524   :  { %v1455_v14 = vadd.f32 1.0, %v3195_v12  ;;  %v3197_v15 = vpop.eup %3196 }
 0x525   :  { %v1532_v20 = vadd.f32 1.0, %v3197_v15 }
 0x526   :  { %3198 = vrcp.f32 %v1455_v14 }
 0x530   :  { %v3199_v0 = vpop.eup %3198 }
 0x531   :  { %v1605_v57 = vmul.f32 %v3199_v0, %v1602_v16  ;;  %v2312_v0 = vld [vmem:[%s3698_s5 + $0x10] sm:$0xff] }
 0x533   :  { %v1606_v8 = vadd.f32 %v1605_v57, %v3497_v40 }
 0x535   :  { %3200 = vtanh.f32 %v1606_v8 }
 0x536   :  { %3202 = vrcp.f32 %v1532_v20 }
 0x53f   :  { %v3201_v1 = vpop.eup %3200 }
 0x540   :  { %v1608_v21 = vsub.f32 %v1377_v58, %v3201_v1  ;;  %v3203_v22 = vpop.eup %3202 }
 0x542   :  { %v1609_v24 = vmul.f32 %v3203_v22, %v1608_v21 }
 0x544   :  { %v1610_v32 = vadd.f32 %v3201_v1, %v1609_v24 }
 0x546   :  { %2873 = vmatmul.mubr.msk.f32.vlgmr.msra.gmra.mrb[24].mxu1 %vm59_vm0, %v1610_v32  ;;  %2884 = vmatmul.mubr.msk.f32.vlgmr.msra.gmra.mrb[30].mxu0 %vm59_vm0, %v1610_v32 }
 0x547   :  { %3102 = vmatpush3.bf16.msra.mxu1 %v3413_v41  ;;  %2894 = vmatprep.mubr.msk.f32.mxu1 %vm3262_vm1, %v3263_v35 }
 0x548   :  { %3103 = vmatprep.subr.bf16.mxu1 %v3261_v19  ;;  %3108 = vmatpush3.bf16.msra.mxu0 %v3358_v18 }
 0x549   :  { %3109 = vmatprep.subr.bf16.mxu0 %v3261_v19  ;;  %2905 = vmatprep.mubr.msk.f32.mxu0 %vm3262_vm1, %v3263_v35 }
 0x54b   :  { %3105 = vmatpush3.bf16.msra.mxu1 %v3426_v45 }
 0x54c   :  { %3112 = vmatprep.subr.bf16.mxu1 %v3261_v19  ;;  %3111 = vmatpush3.bf16.msra.mxu0 %v3376_v27 }
 0x54d   :  { %3118 = vmatprep.subr.bf16.mxu0 %v3261_v19 }
 0x54e   :  { %2895 = vmatmul.mubr.msk.f32.vlgmr.msra.gmra.mrb[26].mxu1 %vm59_vm0, %v1610_v32 }
 0x54f   :  { %3114 = vmatpush3.bf16.msra.mxu1 %v3407_v36  ;;  %2916 = vmatprep.mubr.msk.f32.mxu1 %vm3262_vm1, %v3263_v35 }
 0x550   :  { %3115 = vmatprep.subr.bf16.mxu1 %v3261_v19 }
 0x553   :  { %3117 = vmatpush3.bf16.msra.mxu1 %v3416_v42 }
 0x554   :  { %3124 = vmatprep.subr.bf16.mxu1 %v3261_v19 }
 0x619   :  { %v1680_v40 = vpop.f32.mrb[24].mxu1  ;;  %v1757_v25 = vpop.f32.mrb[30].mxu0 }
 0x61a   :  { %v1684_v26 = vadd.f32 %v1680_v40, %v3474_v4  ;;  %v1761_v28 = vadd.f32 %v1757_v25, %v3468_v62  ;;  %v2874_v30 = vpop.f32.mrb[25].mxu1  ;;  %v2885_v31 = vpop.f32.mrb[31].mxu0 }
 0x61c   :  { %v2462_v33 = vmul.f32 -1.442695, %v1684_v26  ;;  %v2464_v39 = vmul.f32 -1.442695, %v1761_v28 }
 0x61e   :  { %3204 = vpow2.f32 %v2462_v33 }
 0x61f   :  { %3206 = vpow2.f32 %v2464_v39 }
 0x621   :  { %v1834_v34 = vpop.f32.mrb[26].mxu1 }
 0x622   :  { %v2896_v38 = vpop.f32.mrb[27].mxu1  ;;  %v1835_v44 = vadd.f32 %v3506_v54, %v1834_v34 }
 0x628   :  { %v3205_v43 = vpop.eup %3204 }
 0x629   :  { %v1688_v53 = vadd.f32 1.0, %v3205_v43  ;;  %v3207_v48 = vpop.eup %3206 }
 0x62a   :  { %v1765_v51 = vadd.f32 1.0, %v3207_v48 }
 0x62b   :  { %3208 = vrcp.f32 %v1688_v53 }
 0x635   :  { %v3209_v47 = vpop.eup %3208 }
 0x636   :  { %v1838_v49 = vmul.f32 %v3209_v47, %v1835_v44  ;;  %v2476_v44 = vld [vmem:[%s3699_s6] ss:$0 sm:$0xff] }
 0x638   :  { %v1839_v4 = vadd.f32 %v1838_v49, %v3495_v37 }
 0x63a   :  { %3210 = vtanh.f32 %v1839_v4 }
 0x63b   :  { %3212 = vrcp.f32 %v1765_v51 }
 0x644   :  { %v3211_v62 = vpop.eup %3210 }
 0x645   :  { %v1841_v60 = vsub.f32 %v1610_v32, %v3211_v62  ;;  %v3213_v55 = vpop.eup %3212 }
 0x647   :  { %v1842_v23 = vmul.f32 %v3213_v55, %v1841_v60 }
 0x649   :  { %v1843_v52 = vadd.f32 %v3211_v62, %v1842_v23 }
 0x64b   :  { %2906 = vmatmul.mubr.msk.f32.vlgmr.msra.gmra.mrb[32].mxu0 %vm59_vm0, %v1843_v52  ;;  %2917 = vmatmul.mubr.msk.f32.vlgmr.msra.gmra.mrb[28].mxu1 %vm59_vm0, %v1843_v52 }
 0x64c   :  { %3120 = vmatpush3.bf16.msra.mxu0 %v3413_v41  ;;  %2927 = vmatprep.mubr.msk.f32.mxu0 %vm3262_vm1, %v3263_v35 }
 0x64d   :  { %3121 = vmatprep.subr.bf16.mxu0 %v3261_v19  ;;  %3126 = vmatpush3.bf16.msra.mxu1 %v3358_v18 }
 0x64e   :  { %3127 = vmatprep.subr.bf16.mxu1 %v3261_v19  ;;  %2938 = vmatprep.mubr.msk.f32.mxu1 %vm3262_vm1, %v3263_v35 }
 0x650   :  { %3123 = vmatpush3.bf16.msra.mxu0 %v3426_v45 }
 0x651   :  { %3130 = vmatprep.subr.bf16.mxu0 %v3261_v19  ;;  %3129 = vmatpush3.bf16.msra.mxu1 %v3376_v27 }
 0x652   :  { %3136 = vmatprep.subr.bf16.mxu1 %v3261_v19 }
 0x653   :  { %2928 = vmatmul.mubr.msk.f32.vlgmr.msra.gmra.mrb[34].mxu0 %vm59_vm0, %v1843_v52 }
 0x654   :  { %3132 = vmatpush3.bf16.msra.mxu0 %v3407_v36  ;;  %2949 = vmatprep.mubr.msk.f32.mxu0 %vm3262_vm1, %v3263_v35 }
 0x655   :  { %3133 = vmatprep.subr.bf16.mxu0 %v3261_v19 }
 0x658   :  { %3135 = vmatpush3.bf16.msra.mxu0 %v3416_v42 }
 0x659   :  { %3142 = vmatprep.subr.bf16.mxu0 %v3261_v19 }
 0x71e   :  { %v1913_v18 = vpop.f32.mrb[32].mxu0  ;;  %v1990_v37 = vpop.f32.mrb[28].mxu1 }
 0x71f   :  { %v1917_v56 = vadd.f32 %v1913_v18, %v3484_v17  ;;  %v1994_v27 = vadd.f32 %v1990_v37, %v3480_v9  ;;  %v2907_v58 = vpop.f32.mrb[33].mxu0  ;;  %v2918_v29 = vpop.f32.mrb[29].mxu1 }
 0x721   :  { %v2467_v59 = vmul.f32 -1.442695, %v1917_v56  ;;  %v2469_v63 = vmul.f32 -1.442695, %v1994_v27 }
 0x723   :  { %3214 = vpow2.f32 %v2467_v59 }
 0x724   :  { %3216 = vpow2.f32 %v2469_v63 }
 0x726   :  { %v2067_v36 = vpop.f32.mrb[34].mxu0 }
 0x727   :  { %v2929_v61 = vpop.f32.mrb[35].mxu0  ;;  %v2068_v5 = vadd.f32 %v3506_v54, %v2067_v36 }
 0x72d   :  { %v3215_v2 = vpop.eup %3214 }
 0x72e   :  { %v1921_v3 = vadd.f32 1.0, %v3215_v2  ;;  %v3217_v42 = vpop.eup %3216 }
 0x72f   :  { %v1998_v11 = vadd.f32 1.0, %v3217_v42 }
 0x730   :  { %3218 = vrcp.f32 %v1921_v3 }
 0x73a   :  { %v3219_v7 = vpop.eup %3218 }
 0x73b   :  { %v2071_v10 = vmul.f32 %v3219_v7, %v2068_v5 }
 0x73d   :  { %v2072_v17 = vadd.f32 %v2071_v10, %v3501_v50  ;;  %v2310_v50 = vld [vmem:[%s3698_s5] sm:$0xff] }
 0x73f   :  { %3220 = vtanh.f32 %v2072_v17 }
 0x740   :  { %3222 = vrcp.f32 %v1998_v11 }
 0x749   :  { %v3221_v9 = vpop.eup %3220 }
 0x74a   :  { %v2074_v12 = vsub.f32 %v1843_v52, %v3221_v9  ;;  %v3223_v14 = vpop.eup %3222 }
 0x74c   :  { %v2075_v15 = vmul.f32 %v3223_v14, %v2074_v12 }
 0x74e   :  { %v2076_v16 = vadd.f32 %v3221_v9, %v2075_v15 }
 0x750   :  { %2939 = vmatmul.mubr.msk.f32.vlgmr.msra.gmra.mrb[30].mxu1 %vm59_vm0, %v2076_v16  ;;  %2950 = vmatmul.mubr.msk.f32.vlgmr.msra.gmra.mrb[36].mxu0 %vm59_vm0, %v2076_v16 }
 0x751   :  { %3138 = vmatpush3.bf16.msra.mxu1 %v3413_v41  ;;  %2960 = vmatprep.mubr.msk.f32.mxu1 %vm3262_vm1, %v3263_v35  ;;  %v2311_v41 = vld [vmem:[%s3698_s5 + $0x8] sm:$0xff] }
 0x752   :  { %3139 = vmatprep.subr.bf16.mxu1 %v3261_v19  ;;  %2971 = vmatprep.mubr.msk.f32.mxu0 %vm3262_vm1, %v3263_v35  ;;  %v3143_v57 = vpack.c.bf16 %v2311_v41, %v2310_v50  ;;  %v2313_v35 = vld [vmem:[%s3698_s5 + $0x18] sm:$0xff] }
 0x754   :  { %3144 = vmatpush3.bf16.msra.mxu0 %v3143_v57 }
 0x755   :  { %3141 = vmatpush3.bf16.msra.mxu1 %v3426_v45  ;;  %v3146_v45 = vpack.c.bf16 %v2313_v35, %v2312_v0  ;;  %3145 = vmatprep.subr.bf16.mxu0 %v3261_v19 }
 0x758   :  { %2961 = vmatmul.mubr.msk.f32.vlgmr.msra.gmra.mrb[32].mxu1 %vm59_vm0, %v2076_v16  ;;  %3147 = vmatpush3.bf16.msra.mxu0 %v3146_v45 }
 0x823   :  { %v2146_v20 = vpop.f32.mrb[30].mxu1  ;;  %v2223_v8 = vpop.f32.mrb[36].mxu0 }
 0x824   :  { %v2150_v1 = vadd.f32 %v2146_v20, %v3482_v13  ;;  %v2227_v21 = vadd.f32 %v2223_v8, %v3476_v6  ;;  %v2940_v22 = vpop.f32.mrb[31].mxu1  ;;  %v2951_v24 = vpop.f32.mrb[37].mxu0 }
 0x826   :  { %v2472_v32 = vmul.f32 -1.442695, %v2150_v1  ;;  %v2474_v26 = vmul.f32 -1.442695, %v2227_v21 }
 0x828   :  { %3224 = vpow2.f32 %v2472_v32 }
 0x829   :  { %3226 = vpow2.f32 %v2474_v26 }
 0x82b   :  { %v2300_v40 = vpop.f32.mrb[32].mxu1 }
 0x82c   :  { %v2962_v25 = vpop.f32.mrb[33].mxu1  ;;  %v2301_v19 = vadd.f32 %v3506_v54, %v2300_v40 }
 0x832   :  { %v3225_v28 = vpop.eup %3224 }
 0x833   :  { %v2154_v30 = vadd.f32 1.0, %v3225_v28  ;;  %v3227_v31 = vpop.eup %3226 }
 0x834   :  { %v2231_v38 = vadd.f32 1.0, %v3227_v31 }
 0x835   :  { %3228 = vrcp.f32 %v2154_v30 }
 0x83f   :  { %v3229_v33 = vpop.eup %3228 }
 0x840   :  { %v2304_v34 = vmul.f32 %v3229_v33, %v2301_v19 }
 0x842   :  { %v2305_v13 = vadd.f32 %v2304_v34, %v3499_v46 }
 0x844   :  { %3230 = vtanh.f32 %v2305_v13 }
 0x845   :  { %3232 = vrcp.f32 %v2231_v38 }
 0x84e   :  { %v3231_v6 = vpop.eup %3230 }
 0x84f   :  { %v2307_v39 = vsub.f32 %v2076_v16, %v3231_v6  ;;  %v3233_v43 = vpop.eup %3232 }
 0x851   :  { %v2308_v53 = vmul.f32 %v3233_v43, %v2307_v39 }
 0x853   :  { %v2309_v48 = vadd.f32 %v3231_v6, %v2308_v53 }
 0x855   :  { %2972 = vmatmul.mubr.msk.f32.vlgmr.msra.gmra.mrb[38].mxu0 %vm59_vm0, %v2309_v48 }
 0x928   :  { %v2390_v47 = vpop.f32.mrb[38].mxu0 }
 0x929   :  { %v2391_v54 = vadd.f32 %v2476_v44, %v2390_v47  ;;  %v2973_v49 = vpop.f32.mrb[39].mxu0 }
 0x92b   :  { %2395 = vst.msk [vmem:[%s3700_s7] sm:$0xff] %vm2394_vm2, %v2391_v54 }
 0x92c   :  { %2400 = vsyncpa [#allocation3], 1 }

</bundles_post_ra>
